<compile_context>
chip_gen: v7x
topology: tpu7x:2x2x1
jax: 0.10.0
libtpu: 0.0.40
codegen_flags: <defaults>
</compile_context>

<pallas_src>
import numpy as np
import jax
import jax.numpy as jnp
from jax.experimental import pallas as pl
from jax.experimental.pallas import tpu as pltpu


# ----------------------------------------------------------------------------
# static helpers (shape-only, computed at trace time in numpy)
# ----------------------------------------------------------------------------
def _adaptive_pool_matrix(l_in, l_out):
    """(l_in, l_out) averaging matrix matching torch AdaptiveAvgPool windows."""
    p = np.zeros((l_in, l_out), dtype=np.float32)
    for j in range(l_out):
        s = (j * l_in) // l_out
        e = ((j + 1) * l_in + l_out - 1) // l_out
        p[s:e, j] = 1.0 / (e - s)
    return p


def _nearest_idx(l_in, l_out):
    """torch F.interpolate(mode='nearest') source indices."""
    return np.array([(i * l_in) // l_out for i in range(l_out)], dtype=np.int32)


def _combined_repool_matrix(l):
    """Sum of (pool to l-1 then nearest back to l) and (pool to l-2 then back)."""
    q = np.zeros((l, l), dtype=np.float32)
    for lo in (l - 1, l - 2):
        p = _adaptive_pool_matrix(l, lo)
        q += p[:, _nearest_idx(lo, l)]
    return jnp.asarray(q)


# ----------------------------------------------------------------------------
# generation-aware VMEM budgeting
# ----------------------------------------------------------------------------
def _physical_vmem_bytes():
    """Per-TensorCore VMEM capacity; conservative 64 MiB fallback (v7x size)."""
    try:
        return int(pltpu.get_tpu_info().vmem_capacity_bytes)
    except Exception:
        return 64 * 1024 * 1024


def _vmem_limit(need_bytes, physical_bytes):
    """Scoped-VMEM limit for one pallas_call: cover the need, stay below HW."""
    limit = max(int(need_bytes * 1.3), 32 * 1024 * 1024)
    return int(min(limit, int(0.9 * physical_bytes)))


def _pick_pool_ctile(n, c, h, w, itemsize, budget):
    """Channel tile for the pool kernel (double-buffered block + f32 temp)."""
    per_ch = h * w * (2 * itemsize + 4) + 8 * (h + w)
    tc = max(1, budget // max(per_ch, 1))
    if tc >= c:
        tc = c
        # keep both v7x TensorCores busy at batch 1
        if n == 1 and c >= 16:
            tc = max(8, ((c // 2) // 8) * 8)
    else:
        tc = max(8, (tc // 8) * 8)
    return int(tc)


def _pick_fuse_tiles(n, h, w, m, cout, out_itemsize, budget):
    """(TH, MK) for the fuse kernel.

    Constraints: TH == H or TH % 128 == 0 (lane dim of the row block and of the
    flat output block); MK == M or a multiple-of-128 divisor of M (lane dim of
    the w3 block, and no garbage in the contraction).
    """
    def th_cap_for(mk):
        per_row = (8 * mk                      # row block (x2 buffers, f32)
                   + mk * w * 8                # relu(row+col) f32 + bf16 copies
                   + cout * w * 4              # fp32 accumulator
                   + 2 * cout * w * out_itemsize)   # output block (x2 buffers)
        const = 2 * mk * w * 4 + 2 * cout * mk * 2 + (1 << 20)
        return (budget - const) // per_row if budget > const else 0

    cands = [m] + [d for d in (256, 128) if d < m and m % d == 0]
    mk = cands[0]
    for cand in cands:
        mk = cand
        if th_cap_for(cand) >= min(h, 128):
            break

    th_cap = th_cap_for(mk)
    if th_cap >= h:
        th = h
    elif th_cap >= 128:
        th = (th_cap // 128) * 128
    else:
        th = min(h, 128)            # smallest legal tile; vmem_limit covers it
    if n == 1 and th == h and h >= 256:   # megacore: >=2 H-tiles at batch 1
        th = max(128, ((h // 2) // 128) * 128)
    return int(th), int(mk)


# ----------------------------------------------------------------------------
# Pallas kernel 1: adaptive average pools over full W / full H (reductions)
# ----------------------------------------------------------------------------
def _pool_kernel(x_ref, s1_ref, s2_ref):
    xb = x_ref[0]                                            # (TC, H, W)
    # upcast happens inside the reduction -> no fp32 copy of the whole block
    s1_ref[0] = jnp.mean(xb, axis=2, dtype=jnp.float32)      # mean over W -> (TC, H)
    s2_ref[0] = jnp.mean(xb, axis=1, dtype=jnp.float32)      # mean over H -> (TC, W)


def pallas_pool(x, *, vmem_budget, vmem_physical):
    n, c, h, w = x.shape
    itemsize = jnp.dtype(x.dtype).itemsize
    tc = _pick_pool_ctile(n, c, h, w, itemsize, vmem_budget)
    need = tc * (h * w * (2 * itemsize + 4) + 8 * (h + w)) + (1 << 20)
    grid = (n, pl.cdiv(c, tc))
    return pl.pallas_call(
        _pool_kernel,
        out_shape=(jax.ShapeDtypeStruct((n, c, h), jnp.float32),
                   jax.ShapeDtypeStruct((n, c, w), jnp.float32)),
        grid=grid,
        in_specs=[pl.BlockSpec((1, tc, h, w), lambda i, j: (i, j, 0, 0))],
        out_specs=(pl.BlockSpec((1, tc, h), lambda i, j: (i, j, 0)),
                   pl.BlockSpec((1, tc, w), lambda i, j: (i, j, 0))),
        compiler_params=pltpu.CompilerParams(
            dimension_semantics=("parallel", "parallel"),
            vmem_limit_bytes=_vmem_limit(need, vmem_physical)),
    )(x)


# ----------------------------------------------------------------------------
# Pallas kernel 2: out = sigmoid(W3 @ relu(row ⊕ col) + b3), flat lane-dense
# ----------------------------------------------------------------------------
def _fuse_kernel(r_ref, c_ref, w_ref, b_ref, o_ref, acc_ref):
    k = pl.program_id(2)

    @pl.when(k == 0)
    def _():
        acc_ref[...] = jnp.zeros_like(acc_ref)

    r = r_ref[0]                                 # (MK, TH)  f32, TH on lanes
    c = c_ref[0]                                 # (MK, W)   f32, W on lanes
    mk, th = r.shape
    wdim = c.shape[1]

    # relu(row ⊕ col): (MK, TH, W); cast to bf16 before collapsing (TH, W)
    # onto lanes so the unavoidable per-chunk relayout moves half the bytes.
    t = jnp.maximum(r[:, :, None] + c[:, None, :], 0.0).astype(jnp.bfloat16)

    # 1x1 conv as a bf16 MXU matmul with fp32 accumulation:
    # (Cout, MK) @ (MK, TH*W) -> accumulate into the resident fp32 scratch.
    acc_ref[...] += jnp.dot(w_ref[...], t.reshape(mk, th * wdim),
                            preferred_element_type=jnp.float32)

    @pl.when(k == pl.num_programs(2) - 1)
    def _():
        y = acc_ref[...] + b_ref[...]            # (Cout, TH*W) + (Cout, 1)
        # sigmoid(y) == 0.5*tanh(0.5*y) + 0.5  -> single EUP transcendental
        o_ref[0] = (0.5 * jnp.tanh(0.5 * y) + 0.5).astype(o_ref.dtype)


def pallas_fuse(row_t, col_t, w3_bf16, b3, out_dtype, *, vmem_budget, vmem_physical):
    n, m, h = row_t.shape                        # (N, M, H) channel-major
    w = col_t.shape[2]                           # (N, M, W)
    cout = w3_bf16.shape[0]                      # (Cout, M)
    out_item = jnp.dtype(out_dtype).itemsize
    th, mk = _pick_fuse_tiles(n, h, w, m, cout, out_item, vmem_budget)

    need = (2 * mk * th * 4 + 2 * mk * w * 4 + 2 * cout * mk * 2
            + 2 * cout * th * w * out_item            # output blocks
            + cout * th * w * 4                       # fp32 accumulator
            + mk * th * w * 8                         # relu/bf16 temporaries
            + (1 << 20))

    grid = (n, pl.cdiv(h, th), pl.cdiv(m, mk))
    out_flat = pl.pallas_call(
        _fuse_kernel,
        out_shape=jax.ShapeDtypeStruct((n, cout, h * w), out_dtype),
        grid=grid,
        in_specs=[pl.BlockSpec((1, mk, th), lambda i, j, k: (i, k, j)),
                  pl.BlockSpec((1, mk, w), lambda i, j, k: (i, k, 0)),
                  pl.BlockSpec((cout, mk), lambda i, j, k: (0, k)),
                  pl.BlockSpec((cout, 1), lambda i, j, k: (0, 0))],
        out_specs=pl.BlockSpec((1, cout, th * w), lambda i, j, k: (i, 0, j)),
        scratch_shapes=[pltpu.VMEM((cout, th * w), jnp.float32)],
        compiler_params=pltpu.CompilerParams(
            dimension_semantics=("parallel", "parallel", "arbitrary"),
            vmem_limit_bytes=_vmem_limit(need, vmem_physical)),
    )(row_t, col_t, w3_bf16, b3)
    # flat (N, Cout, H*W) -> NCHW is a free row-major reshape outside the kernel
    return out_flat.reshape(n, cout, h, w)


# ----------------------------------------------------------------------------
# SPBlock forward
# ----------------------------------------------------------------------------
def sp_block_forward(x, params):
    n, cin, h, w = x.shape
    assert h > 2 and w > 2, "SPBlock needs H > 2 and W > 2 (pools to H-2 / W-2)."
    out_dtype = x.dtype
    f32 = jnp.float32
    phys = _physical_vmem_bytes()

    w1 = params["conv1_w"].astype(f32)          # (M, Cin, 3, 1)  conv along H
    w2 = params["conv2_w"].astype(f32)          # (M, Cin, 1, 3)  conv along W
    eps = 1e-5
    sc1 = params["bn1_g"] / jnp.sqrt(params["bn1_rv"] + eps)
    sh1 = params["bn1_b"] - params["bn1_rm"] * sc1
    sc2 = params["bn2_g"] / jnp.sqrt(params["bn2_rv"] + eps)
    sh2 = params["bn2_b"] - params["bn2_rm"] * sc2

    # Fold BN scales into the conv weights; shifts combine additively.
    w1s = w1[:, :, :, 0] * sc1[:, None, None]   # (M, C, 3) scaled 3-tap (H conv)
    w2s = w2[:, :, 0, :] * sc2[:, None, None]   # (M, C, 3) scaled 3-tap (W conv)
    w1cs = w1[:, :, 1, 0] * sc1[:, None]        # scaled centre tap of conv1 (x3/x5)
    w2cs = w2[:, :, 0, 1] * sc2[:, None]        # scaled centre tap of conv2 (x4/x6)
    bias_row = sh1 + 2.0 * sh2                  # shifts of x1 + x4 + x6
    bias_col = sh2 + 2.0 * sh1                  # shifts of x2 + x3 + x5

    # ---- Pallas kernel 1: full-map reductions (pool1 / pool2), fp32 ----
    s1, s2 = pallas_pool(x, vmem_budget=int(0.40 * phys), vmem_physical=phys)

    # ---- O(H+W) glue: separable row / column terms (channel-major) ----
    # row term (x1 + interp(x4) + interp(x6))  ->  (N, M, H)
    s1p = jnp.pad(s1, ((0, 0), (0, 0), (1, 1)))
    conv_row = sum(jnp.einsum("mc,nch->nmh", w1s[:, :, k], s1p[:, :, k:k + h])
                   for k in range(3))
    qh = _combined_repool_matrix(h)             # static (H, H)
    rep_row = jnp.einsum("mc,nci->nmi", w2cs,
                         jnp.einsum("nch,hi->nci", s1, qh))
    row_term = conv_row + rep_row + bias_row[None, :, None]

    # column term (x2 + interp(x3) + interp(x5))  ->  (N, M, W)
    s2p = jnp.pad(s2, ((0, 0), (0, 0), (1, 1)))
    conv_col = sum(jnp.einsum("mc,ncw->nmw", w2s[:, :, k], s2p[:, :, k:k + w])
                   for k in range(3))
    qw = _combined_repool_matrix(w)             # static (W, W)
    rep_col = jnp.einsum("mc,ncj->nmj", w1cs,
                         jnp.einsum("ncw,wj->ncj", s2, qw))
    col_term = conv_col + rep_col + bias_col[None, :, None]

    w3 = params["conv3_w"][:, :, 0, 0].astype(jnp.bfloat16)   # (Cout, M)  MXU operand
    b3 = params["conv3_b"].reshape(-1, 1).astype(f32)         # (Cout, 1)

    # ---- Pallas kernel 2: the (H x W) hot path, flat lane-dense store ----
    return pallas_fuse(row_term.astype(f32), col_term.astype(f32),
                       w3, b3, out_dtype,
                       vmem_budget=int(0.35 * phys), vmem_physical=phys)


# ----------------------------------------------------------------------------
# pure-JAX reference (mirrors the PyTorch forward literally) for validation
# ----------------------------------------------------------------------------
def reference_forward(x, params):
    n, cin, h, w = x.shape
    eps = 1e-5
    bcast = lambda v: v[None, :, None, None]

    def bn(y, g, b, rm, rv):
        return (y - bcast(rm)) / jnp.sqrt(bcast(rv) + eps) * bcast(g) + bcast(b)

    def conv(y, wgt, pad):
        return jax.lax.conv_general_dilated(
            y, wgt, (1, 1), pad, dimension_numbers=("NCHW", "OIHW", "NCHW"))

    def apool(y, oh, ow):
        _, _, hh, ww = y.shape
        return jnp.einsum("nchw,hi,wj->ncij", y,
                          jnp.asarray(_adaptive_pool_matrix(hh, oh)),
                          jnp.asarray(_adaptive_pool_matrix(ww, ow)))

    def interp(y, oh, ow):
        _, _, hh, ww = y.shape
        y = jnp.take(y, jnp.asarray(_nearest_idx(hh, oh)), axis=2)
        return jnp.take(y, jnp.asarray(_nearest_idx(ww, ow)), axis=3)

    bn1 = lambda y: bn(y, params["bn1_g"], params["bn1_b"], params["bn1_rm"], params["bn1_rv"])
    bn2 = lambda y: bn(y, params["bn2_g"], params["bn2_b"], params["bn2_rm"], params["bn2_rv"])
    c1 = lambda y: conv(y, params["conv1_w"], ((1, 1), (0, 0)))
    c2 = lambda y: conv(y, params["conv2_w"], ((0, 0), (1, 1)))
    m = params["conv1_w"].shape[0]

    x1 = jnp.broadcast_to(bn1(c1(apool(x, h, 1))), (n, m, h, w))
    x2 = jnp.broadcast_to(bn2(c2(apool(x, 1, w))), (n, m, h, w))
    x3 = interp(jnp.broadcast_to(bn1(c1(apool(x, 1, w - 1))), (n, m, h, w - 1)), h, w)
    x4 = interp(jnp.broadcast_to(bn2(c2(apool(x, h - 1, 1))), (n, m, h - 1, w)), h, w)
    x5 = interp(jnp.broadcast_to(bn1(c1(apool(x, 1, w - 2))), (n, m, h, w - 2)), h, w)
    x6 = interp(jnp.broadcast_to(bn2(c2(apool(x, h - 2, 1))), (n, m, h - 2, w)), h, w)
    s = jax.nn.relu(x1 + x2 + x3 + x4 + x5 + x6)
    y = jnp.einsum("om,nmhw->nohw", params["conv3_w"][:, :, 0, 0], s) \
        + params["conv3_b"][None, :, None, None]
    return jax.nn.sigmoid(y)


# ----------------------------------------------------------------------------
if __name__ == "__main__":
    N, CIN, COUT, H, W = 2, 4, 8, 16, 16      # inplanes=4, outplanes(=midplanes)=8
    key = jax.random.PRNGKey(0)
    ks = jax.random.split(key, 16)
    x = jax.random.normal(ks[0], (N, CIN, H, W), jnp.float32)
    params = {
        "conv1_w": 0.1 * jax.random.normal(ks[1], (COUT, CIN, 3, 1), jnp.float32),
        "conv2_w": 0.1 * jax.random.normal(ks[2], (COUT, CIN, 1, 3), jnp.float32),
        "bn1_g": 1.0 + 0.1 * jax.random.normal(ks[3], (COUT,), jnp.float32),
        "bn1_b": 0.1 * jax.random.normal(ks[4], (COUT,), jnp.float32),
        "bn1_rm": 0.1 * jax.random.normal(ks[5], (COUT,), jnp.float32),
        "bn1_rv": 0.5 + jnp.abs(jax.random.normal(ks[6], (COUT,), jnp.float32)),
        "bn2_g": 1.0 + 0.1 * jax.random.normal(ks[7], (COUT,), jnp.float32),
        "bn2_b": 0.1 * jax.random.normal(ks[8], (COUT,), jnp.float32),
        "bn2_rm": 0.1 * jax.random.normal(ks[9], (COUT,), jnp.float32),
        "bn2_rv": 0.5 + jnp.abs(jax.random.normal(ks[10], (COUT,), jnp.float32)),
        "conv3_w": 0.1 * jax.random.normal(ks[11], (COUT, COUT, 1, 1), jnp.float32),
        "conv3_b": 0.1 * jax.random.normal(ks[12], (COUT,), jnp.float32),
    }

    out = jax.block_until_ready(sp_block_forward(x, params))
    ref = reference_forward(x, params)
    assert out.shape == (N, COUT, H, W), out.shape
    assert out.dtype == x.dtype, out.dtype
    # Tolerance loosened for the bf16 MXU operands (fp32 accumulation).
    err = float(jnp.abs(out - ref).max())
    assert jnp.allclose(out, ref, atol=1e-2, rtol=1e-2), err
    print("KERNEL_OK")
</pallas_src>

<mosaic_0001>
module attributes {stable_mosaic.version = 11 : i64} {
  func.func @_pool_kernel(%arg0: i32, %arg1: i32, %arg2: memref<1x4x16x16xf32, #tpu.memory_space<vmem>>, %arg3: memref<1x4x16xf32, #tpu.memory_space<vmem>>, %arg4: memref<1x4x16xf32, #tpu.memory_space<vmem>>) attributes {dimension_semantics = [#tpu.dimension_semantics<parallel>, #tpu.dimension_semantics<parallel>], iteration_bounds = array<i64: 2, 1>, scalar_prefetch = 0 : i64, scratch_operands = 0 : i64, tpu.core_type = #tpu.core_type<tc>, window_params = [{transform_indices = @transform_0, window_bounds = array<i64: 1, 4, 16, 16>}, {transform_indices = @transform_1, window_bounds = array<i64: 1, 4, 16>}, {transform_indices = @transform_2, window_bounds = array<i64: 1, 4, 16>}]} {
    %c0 = arith.constant 0 : index
    %c0_0 = arith.constant 0 : index
    %c0_1 = arith.constant 0 : index
    %c0_2 = arith.constant 0 : index
    %0 = vector.load %arg2[%c0, %c0_0, %c0_1, %c0_2] : memref<1x4x16x16xf32, #tpu.memory_space<vmem>>, vector<1x4x16x16xf32>
    %1 = vector.shape_cast %0 : vector<1x4x16x16xf32> to vector<4x16x16xf32>
    %cst = arith.constant dense<0.000000e+00> : vector<4x16xf32>
    %2 = vector.multi_reduction <add>, %1, %cst [2] : vector<4x16x16xf32> to vector<4x16xf32>
    %cst_3 = arith.constant 1.600000e+01 : f32
    %3 = vector.broadcast %cst_3 : f32 to vector<4x16xf32>
    %4 = arith.divf %2, %3 : vector<4x16xf32>
    %c0_4 = arith.constant 0 : index
    %c0_5 = arith.constant 0 : index
    %c0_6 = arith.constant 0 : index
    %5 = vector.load %arg3[%c0_4, %c0_5, %c0_6] : memref<1x4x16xf32, #tpu.memory_space<vmem>>, vector<1x4x16xf32>
    %6 = vector.shape_cast %5 : vector<1x4x16xf32> to vector<4x16xf32>
    %7 = vector.shape_cast %4 : vector<4x16xf32> to vector<1x4x16xf32>
    tpu.vector_store %arg3[%c0_4, %c0_5, %c0_6], %7 {strides = array<i32>} : memref<1x4x16xf32, #tpu.memory_space<vmem>>, vector<1x4x16xf32>,
    %cst_7 = arith.constant dense<0.000000e+00> : vector<4x16xf32>
    %8 = vector.multi_reduction <add>, %1, %cst_7 [1] : vector<4x16x16xf32> to vector<4x16xf32>
    %cst_8 = arith.constant 1.600000e+01 : f32
    %9 = vector.broadcast %cst_8 : f32 to vector<4x16xf32>
    %10 = arith.divf %8, %9 : vector<4x16xf32>
    %c0_9 = arith.constant 0 : index
    %c0_10 = arith.constant 0 : index
    %c0_11 = arith.constant 0 : index
    %11 = vector.load %arg4[%c0_9, %c0_10, %c0_11] : memref<1x4x16xf32, #tpu.memory_space<vmem>>, vector<1x4x16xf32>
    %12 = vector.shape_cast %11 : vector<1x4x16xf32> to vector<4x16xf32>
    %13 = vector.shape_cast %10 : vector<4x16xf32> to vector<1x4x16xf32>
    tpu.vector_store %arg4[%c0_9, %c0_10, %c0_11], %13 {strides = array<i32>} : memref<1x4x16xf32, #tpu.memory_space<vmem>>, vector<1x4x16xf32>,
    return
  }
  func.func @transform_0(%arg0: i32, %arg1: i32) -> (i32, i32, i32, i32) {
    %c0_i32 = arith.constant 0 : i32
    %c0_i32_0 = arith.constant 0 : i32
    %c0_i32_1 = arith.constant 0 : i32
    return %arg0, %arg1, %c0_i32, %c0_i32_0 : i32, i32, i32, i32
  }
  func.func @transform_1(%arg0: i32, %arg1: i32) -> (i32, i32, i32) {
    %c0_i32 = arith.constant 0 : i32
    %c0_i32_0 = arith.constant 0 : i32
    return %arg0, %arg1, %c0_i32 : i32, i32, i32
  }
  func.func @transform_2(%arg0: i32, %arg1: i32) -> (i32, i32, i32) {
    %c0_i32 = arith.constant 0 : i32
    %c0_i32_0 = arith.constant 0 : i32
    return %arg0, %arg1, %c0_i32 : i32, i32, i32
  }
}

</mosaic_0001>

<bundles_post_ra>
// kernel: tpu_custom_call.1
= control target key start
LH: loop header
LB: loop body
LE: loop exit
PB: predicated region body
PF: predicated region fallthrough
CT: control target
= control target key end

     0   :  { %8 = vsyncpa [#allocation3], 0  ;;  %s962_s0 = inlined_call_operand.hbm [shape: f32[2,4,16,16], index: 0, kind: input, shape index: {}]   ;;  %s963_s1 = inlined_call_operand.hbm [shape: f32[2,4,16], index: 1, kind: output, shape index: {0}]   ;;  %s964_s2 = inlined_call_operand.hbm [shape: f32[2,4,16], index: 2, kind: output, shape index: {1}]  }
   0x1   :  { %10 = vsyncpa [#allocation3 + $0x1], 0 }
   0x2   :  { %11 = vsyncpa [#allocation4], 0 }
   0x3   :  { %13 = vsyncpa [#allocation4 + $0x1], 0 }
   0x4   :  { %14 = vsyncpa [#allocation7], 0 }
   0x5   :  { %16 = vsyncpa [#allocation7 + $0x1], 0  ;;  %s737_s9 = smov 0   ;;  %s739_s10 = smov 0  }
   0x6   :  { %s741_s11 = smov 0   ;;  %s743_s12 = smov 0  }
   0x7   :  { %s745_s13 = smov 0   ;;  %s747_s14 = smov 0  }
   0x8 LB: > { %s484_s15 = sadd.s32 4294967295, %s715_s14   ;;  %s485_s16 = sadd.s32 4294967294, %s715_s14   ;;  %s715_s14 = sphi %s747_s14, %s22_s14   ;;  %s711_s13 = sphi %s745_s13, %s979_s13   ;;  %s707_s12 = sphi %s743_s12, %s978_s12   ;;  %s703_s11 = sphi %s741_s11, %s977_s11   ;;  %s699_s10 = sphi %s739_s10, %s976_s10   ;;  %s695_s9 = sphi %s737_s9, %s975_s9  }
   0x9   : > { %s34_s17 = sadd.s32 1, %s711_s13  ;;  %s43_s18 = sadd.s32 1, %s703_s11 }
   0xa   : > { %p36_p0 = scmp.ge.s32.totalorder %s34_s17, 2  ;;  %p50_p1 = scmp.ne.s32.totalorder %s703_s11, %s699_s10 }
   0xb   : > { %p51_p2 = scmp.eq.s32.totalorder %s715_s14, 0  ;;  %p56_p3 = scmp.ne.s32.totalorder %s699_s10, %s695_s9 }
   0xc   : > { %s981_s17 = smov (%p36_p0, %s34_s17), 0  ;;  %p57_p5 = scmp.eq.s32.totalorder %s484_s15, 0 }
   0xd   : > { %p778_p4 = por %p51_p2, %p50_p1  ;;  %s38_s20 = ssub.s32 %s711_s13, %s981_s17 }
   0xe   : > { %p82_p6 = scmp.eq.s32.totalorder %s484_s15, 1  ;;  %p41_p7 = scmp.eq.s32.totalorder %s38_s20, 0 }
   0xf   : > { %p784_p8 = por %p57_p5, %p56_p3  ;;  %p88_p10 = scmp.eq.s32.totalorder %s485_s16, 1 }
  0x10   : > { %p788_p9 = por %p82_p6, %p50_p1  ;;  %p519_p13 = scmp.lt.s32.totalorder %s715_s14, 2 }
  0x11   : > { %s793_s23 = scalar_select %p41_p7, %s703_s11, %s43_s18  }
  0x12   : > { %s968_s22 = scalar_select %p788_p9, 1, 0 }
  0x13   : > { %p795_p11 = por %p88_p10, %p56_p3  ;;  %s136_s25 = sand.u32 1, %s703_s11  }
  0x14   : > { %s488_s26 = sshll.u32 %s136_s25, 6  ;;  %s501_s27 = sshll.u32 %s711_s13, 10 }
  0x15   : > { %s969_s24 = scalar_select %p795_p11, 1, 0 }
  0x16   : > { %s806_s30 = scalar_lea.hbm %s962_s0, %s501_s27  ;;  %s140_s3 = scalar_lea.vmem [#allocation2], %s488_s26 }
  0x17   : > { %s150_s4 = sshll.u32 %s140_s3, 4  ;;  %p812_p0 = pnand %p519_p13, %p778_p4  ;;  %s808_s4 = int_to_ptr.vmem [resolvable:$true] %s150_s4 }
  0x18   : > { %s817_s6 = scalar_lea.sflag [#allocation3], %s136_s25  ;;  %s571_s7 = scalar_lea.hbm %s806_s30, 1024 }
  0x19   : > { %p572_p2 = scmp.ne.s32.totalorder %s806_s30, %s571_s7  ;;  %p573_p3 = pneg %p812_p0 }
  0x1a   : > { %s576_s16 = scalar_lea.hbm %s962_s0, 2048  ;;  %p577_p4 = scmp.lt.u32.totalorder %s806_s30, %s962_s0 }
  0x1b   : > { %p574_p5 = pnand %p573_p3, %p572_p2  ;;  %p578_p7 = scmp.lt.u32.totalorder %s576_s16, %s571_s7 }
  0x1c   : > { %p580_p13 = scmp.lt.u32.totalorder %s571_s7, %s806_s30 }
  0x1d   : > { %p575_p6 = pneg %p574_p5  ;;  %p579_p10 = por %p578_p7, %p577_p4 }
  0x1f   : > { %p581_p12 = por %p580_p13, %p579_p10 }
  0x21   : > { %p582_p1 = pnand %p581_p12, %p575_p6 }
  0x23   : > { %585 = shalt.err (!%p582_p1)
}
  0x24   : > { %s586_s20 = scalar_lea.vmem %s808_s4, 1024  ;;  %s717_s25 = smov [#allocation2]  }
  0x25   : > { %p587_p2 = scmp.ne.s32.totalorder %s808_s4, %s586_s20  ;;  %s591_s26 = sshll.u32 %s717_s25, 4  ;;  %s592_s26 = int_to_ptr.vmem [resolvable:$false] %s591_s26 }
  0x26   : > { %s593_s27 = scalar_lea.vmem %s592_s26, 2048  ;;  %p594_p9 = scmp.lt.s32.totalorder %s808_s4, %s592_s26 }
  0x27   : > { %p589_p5 = pnand %p587_p2, %p573_p3  ;;  %p595_p4 = scmp.lt.s32.totalorder %s593_s27, %s586_s20 }
  0x29   : > { %p590_p11 = pneg %p589_p5  ;;  %p596_p7 = por %p595_p4, %p594_p9 }
  0x2b   : > { %p597_p10 = pnand %p596_p7, %p590_p11 }
  0x2d   : > { %600 = shalt.err (!%p597_p10)
}
  0x2e   : > { %s718_s28 = smov 128   ;;  %s719_s29 = smov 8  }
  0x2f   : > { %511 = dma.hbm_to_vmem [thread:$0]  (!%p812_p0), %s806_s30, 1024, %s808_s4, %s817_s6, %s718_s28, %s718_s28, %s719_s29  }
  0x30   : > { %p158_p12 = scmp.lt.s32.totalorder %s715_s14, 3  ;;  %p971_p1 = scmp.ge.s32.totalorder %s715_s14, 1 }
  0x32   : > { %p159_p3 = pnand %p971_p1, %p158_p12 }
  0x33   : > { %s849_s3 = sand.u32 (!%p159_p3), 1, %s699_s10  }
  0x34   : > { %162 = sbr.rel (%p159_p3) target bundleno = 236 (0xec), region = 24  ;;  %s492_s7 = sshll.u32 (!%p159_p3), %s849_s3, 6 }
  0x35   : > { %s165_s8 = scalar_lea.sflag (!%p159_p3), [#allocation3], %s849_s3  ;;  %s168_s15 = scalar_lea.vmem (!%p159_p3), [#allocation2], %s492_s7 }
  0x3b   : > { %682 = dma.done.wait (%p784_p8), %s165_s8, 1024  }
  0x3c   : > { %684 = vsyncadd (%p784_p8), %s165_s8, 4294966272  ;;  %vm203_vm0 = vcmask 130048   ;;  %v197_v0 = vld [vmem:[%s168_s15 + $0x10] sm:$0xff]  ;;  %v195_v1 = vld [vmem:[%s168_s15] sm:$0xff]  ;;  %vm285_vm1 = vcmask 1041409   ;;  %vm289_vm2 = vcmask 1043459  }
  0x3d   : > { %v198_v2 = vld [vmem:[%s168_s15 + $0x18] sm:$0xff]  ;;  %v210_v3 = vsel %vm203_vm0, %v197_v0, 0.0  ;;  %v204_v4 = vsel %vm203_vm0, %v195_v1, 0.0  ;;  %v196_v6 = vld [vmem:[%s168_s15 + $0x8] sm:$0xff]  ;;  %v199_v8 = vld [vmem:[%s168_s15 + $0x20] sm:$0xff]  ;;  %vm287_vm3 = vcmask 1042434  }
  0x3e   : > { %v213_v5 = vsel %vm203_vm0, %v198_v2, 0.0  ;;  %v200_v7 = vld [vmem:[%s168_s15 + $0x28] sm:$0xff]  ;;  %211 = vadd.xlane.f32.xlu1 %v210_v3  ;;  %205 = vadd.xlane.f32.xlu0 %v204_v4  ;;  %v207_v10 = vsel %vm203_vm0, %v196_v6, 0.0  ;;  %v216_v12 = vsel %vm203_vm0, %v199_v8, 0.0  ;;  %v202_v13 = vld [vmem:[%s168_s15 + $0x38] sm:$0xff]  ;;  %v201_v14 = vld [vmem:[%s168_s15 + $0x30] sm:$0xff] }
  0x3f   : > { %v301_v9 = vadd.f32 %v213_v5, %v210_v3  ;;  %v219_v11 = vsel %vm203_vm0, %v200_v7, 0.0  ;;  %v294_v15 = vadd.f32 %v207_v10, %v204_v4  ;;  %v225_v17 = vsel %vm203_vm0, %v202_v13, 0.0  ;;  %s493_s21 = sshll.u32 %s849_s3, 2  ;;  %s497_s30 = sshll.u32 %s707_s12, 6 }
  0x40   : > { %v308_v16 = vadd.f32 %v219_v11, %v216_v12  ;;  %v222_v18 = vsel %vm203_vm0, %v201_v14, 0.0  ;;  %vm292_vm4 = vcmask 125952   ;;  %s193_s4 = scalar_lea.vmem [#allocation6], %s493_s21  ;;  %s878_s16 = scalar_lea.hbm %s964_s2, %s497_s30 }
  0x41   : > { %v302_v19 = vrot.slane %v301_v9, 4  ;;  %v315_v20 = vadd.f32 %v225_v17, %v222_v18  ;;  %v295_v21 = vrot.slane %v294_v15, 4  ;;  %s369_s18 = sshll.u32 %s193_s4, 4  ;;  %s341_s19 = scalar_lea.sflag [#allocation7], %s849_s3  ;;  %s370_s18 = int_to_ptr.vmem [resolvable:$true] %s369_s18 }
  0x42   : > { %v309_v22 = vrot.slane %v308_v16, 4  ;;  %214 = vadd.xlane.f32.xlu1 %v213_v5  ;;  %208 = vadd.xlane.f32.xlu0 %v207_v10  ;;  %s601_s20 = scalar_lea.vmem %s370_s18, 64  ;;  %p972_p9 = scmp.ne.s32.totalorder %s968_s22, 0 }
  0x43   : > { %v303_v23 = vadd.f32 %v302_v19, %v301_v9  ;;  %v316_v24 = vrot.slane %v315_v20, 4  ;;  %v296_v25 = vadd.f32 %v295_v21, %v294_v15  ;;  %p602_p8 = scmp.ne.s32.totalorder %s370_s18, %s601_s20  ;;  %s720_s25 = smov [#allocation6]  }
  0x44   : > { %v310_v26 = vadd.f32 %v309_v22, %v308_v16  ;;  %s605_s26 = sshll.u32 %s720_s25, 4  ;;  %s606_s26 = int_to_ptr.vmem [resolvable:$false] %s605_s26 }
  0x45   : > { %v304_v27 = vrot.slane %v303_v23, 2  ;;  %v297_v28 = vrot.slane %v296_v25, 2  ;;  %v317_v29 = vadd.f32 %v316_v24, %v315_v20  ;;  %p603_p11 = pnand %p602_p8, %p972_p9  ;;  %s607_s27 = scalar_lea.vmem %s606_s26, 128 }
  0x46   : > { %220 = vadd.xlane.f32.xlu1 %v219_v11  ;;  %217 = vadd.xlane.f32.xlu0 %v216_v12  ;;  %v311_v30 = vrot.slane %v310_v26, 2  ;;  %p608_p6 = scmp.lt.s32.totalorder %s370_s18, %s606_s26  ;;  %p609_p13 = scmp.lt.s32.totalorder %s607_s27, %s601_s20 }
  0x47   : > { %v305_v31 = vadd.f32 %v304_v27, %v303_v23  ;;  %v298_v32 = vadd.f32 %v297_v28, %v296_v25  ;;  %v318_v33 = vrot.slane %v317_v29, 2  ;;  %p604_p0 = pneg %p603_p11 }
  0x48   : > { %v312_v34 = vadd.f32 %v311_v30, %v310_v26  ;;  %p610_p2 = por %p609_p13, %p608_p6 }
  0x49   : > { %v306_v35 = vrot.slane %v305_v31, 1  ;;  %v299_v36 = vrot.slane %v298_v32, 1  ;;  %v319_v37 = vadd.f32 %v318_v33, %v317_v29 }
  0x4a   : > { %226 = vadd.xlane.f32.xlu1 %v225_v17  ;;  %223 = vadd.xlane.f32.xlu0 %v222_v18  ;;  %v313_v38 = vrot.slane %v312_v34, 1  ;;  %p611_p5 = pnand %p610_p2, %p604_p0 }
  0x4b   : > { %v307_v39 = vadd.f32 %v306_v35, %v305_v31  ;;  %v300_v40 = vadd.f32 %v299_v36, %v298_v32  ;;  %v320_v41 = vrot.slane %v319_v37, 1 }
  0x4c   : > { %v314_v42 = vadd.f32 %v313_v38, %v312_v34 }
  0x4d   : > { %v323_v43 = vmul.f32 0.0625, %v307_v39  ;;  %v322_v44 = vmul.f32 0.0625, %v300_v40  ;;  %v321_v45 = vadd.f32 %v320_v41, %v319_v37 }
  0x4e   : > { %v324_v46 = vmul.f32 0.0625, %v314_v42 }
  0x4f   : > { %v325_v47 = vmul.f32 0.0625, %v321_v45  ;;  %v330_v48 = vsel %vm285_vm1, %v323_v43, %v322_v44 }
  0x50   : > { %v331_v49 = vsel %vm287_vm3, %v324_v46, %v330_v48 }
  0x51   : > { %v332_v50 = vsel %vm289_vm2, %v325_v47, %v331_v49 }
  0x52   : > { %334 = vst.msk [vmem:[%s193_s4] sm:$0xf] %vm292_vm4, %v332_v50 }
  0x53   : > { %614 = shalt.err (!%p611_p5)
}
  0x54   : > { %s615_s28 = scalar_lea.hbm %s878_s16, 64  ;;  %s619_s8 = scalar_lea.hbm %s964_s2, 128 }
  0x55   : > { %p616_p4 = scmp.ne.s32.totalorder %s878_s16, %s615_s28  ;;  %p620_p12 = scmp.lt.u32.totalorder %s878_s16, %s964_s2 }
  0x56   : > { %p621_p1 = scmp.lt.u32.totalorder %s619_s8, %s615_s28  ;;  %p623_p8 = scmp.lt.u32.totalorder %s615_s28, %s878_s16 }
  0x57   : > { %p617_p7 = pnand %p616_p4, %p972_p9 }
  0x58   : > { %p622_p3 = por %p621_p1, %p620_p12 }
  0x59   : > { %p618_p10 = pneg %p617_p7 }
  0x5a   : > { %p624_p11 = por %p623_p8, %p622_p3 }
  0x5c   : > { %p625_p0 = pnand %p624_p11, %p618_p10 }
  0x5e   : > { %628 = shalt.err (!%p625_p0)
}
  0x5f   : > { %505 = dma.vmem_to_hbm [thread:$0]  (%p972_p9), %s370_s18, 64, %s878_s16, %s341_s19   ;;  %v245_v51 = vlaneseq  ;;  %vm256_vm5 = vcmask 130112  }
  0x60   : > { %s186_s5 = scalar_lea.vmem [#allocation5], %s493_s21  ;;  %s911_s19 = scalar_lea.hbm %s963_s1, %s497_s30 }
  0x61   : > { %v246_v52 = vand.u32 127, %v245_v51  ;;  %v248_v56 = vshrl.u32 %v245_v51, 7  ;;  %s355_s6 = sshll.u32 %s186_s5, 4  ;;  %s336_s21 = scalar_lea.sflag [#allocation4], %s849_s3  ;;  %s913_s6 = int_to_ptr.vmem [resolvable:$true] %s355_s6 }
  0x62   : > { %s629_s20 = scalar_lea.vmem %s913_s6, 64  ;;  %s721_s12 = smov [#allocation5]  }
  0x63   : > { %v251_v55 = vadd.s32 4294967288, %v246_v52  ;;  %v249_v62 = vsub.s32 %v246_v52, %v248_v56  ;;  %p630_p6 = scmp.ne.s32.totalorder %s913_s6, %s629_s20  ;;  %s633_s25 = sshll.u32 %s721_s12, 4  ;;  %s634_s25 = int_to_ptr.vmem [resolvable:$false] %s633_s25 }
  0x64   : > { %s635_s30 = scalar_lea.vmem %s634_s25, 128  ;;  %p636_p5 = scmp.lt.s32.totalorder %s913_s6, %s634_s25 }
  0x65   : > { %v254_v59 = vsub.s32 %v251_v55, %v248_v56  ;;  %p631_p13 = pnand %p630_p6, %p972_p9  ;;  %p637_p4 = scmp.lt.s32.totalorder %s635_s30, %s629_s20 }
  0x67   : > { %p632_p2 = pneg %p631_p13  ;;  %p638_p7 = por %p637_p4, %p636_p5 }
  0x69   : > { %p639_p10 = pnand %p638_p7, %p632_p2 }
  0xcb   : > { %v212_v53 = vpop.xlane.xlu1 %211  ;;  %v206_v54 = vpop.xlane.xlu0 %205 }
  0xcc   : > { %v231_v63 = vmul.f32 0.0625, %v212_v53  ;;  %v229_v0 = vmul.f32 0.0625, %v206_v54 }
  0xce   : > { %v261_v7 = vrot.slane %v231_v63, %v249_v62  ;;  %v250_v8 = vrot.slane %v229_v0, %v249_v62 }
  0xcf   : > { %v215_v57 = vpop.xlane.xlu1 %214  ;;  %v209_v58 = vpop.xlane.xlu0 %208 }
  0xd0   : > { %v232_v60 = vmul.f32 0.0625, %v215_v57  ;;  %v230_v61 = vmul.f32 0.0625, %v209_v58 }
  0xd2   : > { %v265_v3 = vrot.slane %v232_v60, %v254_v59  ;;  %v255_v4 = vrot.slane %v230_v61, %v254_v59 }
  0xd3   : > { %v221_v1 = vpop.xlane.xlu1 %220  ;;  %v218_v2 = vpop.xlane.xlu0 %217 }
  0xd4   : > { %v234_v5 = vmul.f32 0.0625, %v221_v1  ;;  %v233_v6 = vmul.f32 0.0625, %v218_v2  ;;  %v266_v13 = vsel %vm256_vm5, %v265_v3, %v261_v7  ;;  %v257_v14 = vsel %vm256_vm5, %v255_v4, %v250_v8 }
  0xd5   : > { %v286_v20 = vsel %vm285_vm1, %v266_v13, %v257_v14 }
  0xd6   : > { %v274_v9 = vrot.slane %v234_v5, %v254_v59  ;;  %v270_v10 = vrot.slane %v233_v6, %v249_v62 }
  0xd7   : > { %v227_v11 = vpop.xlane.xlu1 %226  ;;  %v224_v12 = vpop.xlane.xlu0 %223 }
  0xd8   : > { %v236_v15 = vmul.f32 0.0625, %v227_v11  ;;  %v235_v16 = vmul.f32 0.0625, %v224_v12  ;;  %v275_v17 = vsel %vm256_vm5, %v274_v9, %v270_v10 }
  0xd9   : > { %v288_v21 = vsel %vm287_vm3, %v275_v17, %v286_v20 }
  0xda   : > { %v283_v18 = vrot.slane %v236_v15, %v254_v59  ;;  %v279_v19 = vrot.slane %v235_v16, %v249_v62 }
  0xdc   : > { %v284_v22 = vsel %vm256_vm5, %v283_v18, %v279_v19 }
  0xdd   : > { %v290_v23 = vsel %vm289_vm2, %v284_v22, %v288_v21 }
  0xde   : > { %293 = vst.msk [vmem:[%s186_s5] sm:$0xf] %vm292_vm4, %v290_v23 }
  0xdf   : > { %642 = shalt.err (!%p639_p10)
}
  0xe0   : > { %s643_s3 = scalar_lea.hbm %s911_s19, 64  ;;  %s647_s28 = scalar_lea.hbm %s963_s1, 128 }
  0xe1   : > { %p644_p12 = scmp.ne.s32.totalorder %s911_s19, %s643_s3  ;;  %p648_p8 = scmp.lt.u32.totalorder %s911_s19, %s963_s1 }
  0xe2   : > { %p649_p11 = scmp.lt.u32.totalorder %s647_s28, %s643_s3  ;;  %p651_p6 = scmp.lt.u32.totalorder %s643_s3, %s911_s19 }
  0xe3   : > { %p645_p1 = pnand %p644_p12, %p972_p9 }
  0xe4   : > { %p650_p0 = por %p649_p11, %p648_p8 }
  0xe5   : > { %p646_p3 = pneg %p645_p1 }
  0xe6   : > { %p652_p13 = por %p651_p6, %p650_p0 }
  0xe8   : > { %p653_p2 = pnand %p652_p13, %p646_p3 }
  0xea   : > { %656 = shalt.err (!%p653_p2)
}
  0xeb   : > { %504 = dma.vmem_to_hbm [thread:$0]  (%p972_p9), %s913_s6, 64, %s911_s19, %s336_s21  }
  0xec PF: > { %s381_s8 = sand.u32 1, %s695_s9   ;;  %p973_p5 = scmp.ne.s32.totalorder %s969_s24, 0 }
  0xed   : > { %p974_p4 = scmp.ge.s32.totalorder %s715_s14, 2  ;;  %s382_s15 = scalar_lea.sflag [#allocation4], %s381_s8 }
  0xef   : > { %p513_p7 = pnand %p974_p4, %p973_p5 }
  0xf1   : > { %686 = dma.done.wait (!%p513_p7), %s382_s15, 64  }
  0xf2   : > { %688 = vsyncadd (!%p513_p7), %s382_s15, 4294967232  ;;  %s391_s4 = scalar_lea.sflag [#allocation7], %s381_s8 }
  0xf3   : > { %690 = dma.done.wait (!%p513_p7), %s391_s4, 64  }
  0xf4   : > { %692 = vsyncadd (!%p513_p7), %s391_s4, 4294967232  ;;  %s22_s14 = sadd.s32 1, %s715_s14   ;;  %s975_s9 = smov %s699_s10 }
  0xf5   : > { %p19_p10 = scmp.ge.s32.totalorder %s22_s14, 4   ;;  %s976_s10 = smov %s703_s11 }
  0xf6   : > { %s977_s11 = smov %s793_s23  ;;  %s978_s12 = smov %s711_s13 }
  0xf7   : > { %s979_s13 = smov %s981_s17  ;;  %21 = sbr.rel (!%p19_p10) target bundleno = 8 (0x8), region = 86 }
  0xfe   :  { %396 = vsyncpa [#allocation3], 1 }
  0xff   :  { %398 = vsyncpa [#allocation3 + $0x1], 1 }
 0x100   :  { %399 = vsyncpa [#allocation4], 1 }
 0x101   :  { %401 = vsyncpa [#allocation4 + $0x1], 1 }
 0x102   :  { %402 = vsyncpa [#allocation7], 1 }
 0x103   :  { %404 = vsyncpa [#allocation7 + $0x1], 1 }

</bundles_post_ra>
